<compile_context>
chip_gen: v6e
topology: v6e:2x2x1
jax: 0.10.0
libtpu: 0.0.40
codegen_flags: <defaults>
</compile_context>

<pallas_src>
import jax
import jax.numpy as jnp
import numpy as np
from jax.experimental import pallas as pl
from jax.experimental.pallas import tpu as pltpu


def focus_kernel(x_ref, params_ref, wk_ref, mask_ref, o_ref):
    B, C, N = x_ref.shape
    BN = B * N
    K = mask_ref.shape[0]
    pad = K // 2
    eps = 1e-5
    inv_bn = 1.0 / float(BN)

    # ---- fold batch into the lane axis: (B, C, N) -> (C, B*N) slab ----
    # RoPE-style lane concat of the per-batch (C, N) pieces; no XLA transpose.
    x = jnp.concatenate([x_ref[b] for b in range(B)], axis=-1)   # (C, BN) f32

    # ---- BatchNorm1d (training-mode biased batch stats), single pass ----
    s1 = jnp.sum(x, axis=1, keepdims=True)                       # (C, 1)
    s2 = jnp.sum(x * x, axis=1, keepdims=True)                   # (C, 1)
    mean = s1 * inv_bn
    var = jnp.maximum(s2 * inv_bn - mean * mean, 0.0)            # clamp rounding
    gamma = params_ref[:, 0:1]
    beta = params_ref[:, 1:2]
    bias = params_ref[:, 2:3]                                    # folded conv bias
    scale = jax.lax.rsqrt(var + eps) * gamma                     # fused BN affine
    shift = beta - mean * scale
    xn = x * scale + shift                                       # (C, BN) f32

    # ---- build stacked RHS: K rolled+masked copies along sublanes ----
    masks = mask_ref[...]                                        # (K, BN) 0/1 consts
    parts = []
    for k in range(K):                                           # K small & static
        d = k - pad
        if d == 0:
            parts.append(xn)
        else:
            rolled = pltpu.roll(xn, shift=(-d) % BN, axis=1)     # XLU lane rotate
            parts.append(rolled * masks[k:k + 1, :])             # halo/batch-edge zero
    src = jnp.concatenate(parts, axis=0).astype(jnp.bfloat16)    # (K*C, BN) bf16

    # ---- single MXU pass: folded to_v -> rel_pos -> to_out ----
    y = jnp.dot(wk_ref[...], src, preferred_element_type=jnp.float32)  # (C, BN) f32
    y = y + bias

    # ---- unfold lanes back to (B, C, N) with static 64-lane slices ----
    for b in range(B):
        o_ref[b] = y[:, b * N:(b + 1) * N]


def fold_focus_params(gamma, beta, wv, wr, br, wo, bo, *, heads, batch, seq):
    """One-time parameter fold — call at parameter-load time, NOT per forward."""
    inner = wv.shape[0]
    dim_head = inner // heads
    C = wo.shape[0]
    K = wr.shape[1]
    pad = K // 2

    # 'b (c h) n -> (b c) h n': head is the fast factor -> channel i uses head i % heads.
    wr_full = jnp.tile(wr, (dim_head, 1))                        # (inner, K)
    br_full = jnp.tile(br, (dim_head,))                          # (inner,)

    # Wk[k] = wo @ diag(wr_full[:, k]) @ wv, stacked along the contraction axis.
    wk = jnp.einsum('ci,ik,id->ckd', wo, wr_full, wv,
                    precision=jax.lax.Precision.HIGHEST)         # (C, K, C)
    wk_stacked = wk.reshape(C, K * C).astype(jnp.bfloat16)       # bf16 MXU operand

    bias_const = wo @ br_full + bo                               # (C,)
    params = jnp.stack([gamma, beta, bias_const], axis=1)        # (C, 3) f32

    # Trace-time-constant halo / batch-boundary masks (depend only on statics).
    pos = np.arange(batch * seq) % seq
    rows = []
    for k in range(K):
        d = k - pad
        if d < 0:
            m = pos >= -d
        else:
            m = pos < seq - d
        rows.append(m.astype(np.float32))
    masks = jnp.asarray(np.stack(rows))                          # (K, B*N)

    return params, wk_stacked, masks


def focus_forward(x, params, wk_stacked, masks):
    B, C, N = x.shape
    vmem = pl.BlockSpec(memory_space=pltpu.MemorySpace.VMEM)
    return pl.pallas_call(
        focus_kernel,
        out_shape=jax.ShapeDtypeStruct((B, C, N), jnp.float32),
        in_specs=[vmem] * 4,
        out_specs=vmem,
    )(x, params, wk_stacked, masks)


def focus_reference(x, gamma, beta, wv, wr, br, wo, bo, *, heads):
    """Pure-JAX reference mirroring the PyTorch forward."""
    eps = 1e-5
    mean = x.mean(axis=(0, 2), keepdims=True)
    var = ((x - mean) ** 2).mean(axis=(0, 2), keepdims=True)
    xn = (x - mean) / jnp.sqrt(var + eps) * gamma[None, :, None] + beta[None, :, None]
    v = jnp.einsum('oc,bcn->bon', wv, xn, precision=jax.lax.Precision.HIGHEST)
    B, inner, N = v.shape
    K = wr.shape[1]
    pad = K // 2
    wr_full = jnp.tile(wr, (inner // heads, 1))
    br_full = jnp.tile(br, (inner // heads,))
    vp = jnp.pad(v, ((0, 0), (0, 0), (pad, pad)))
    out = sum(wr_full[None, :, k:k + 1] * vp[:, :, k:k + N] for k in range(K))
    out = out + br_full[None, :, None]
    y = jnp.einsum('oc,bcn->bon', wo, out, precision=jax.lax.Precision.HIGHEST)
    return y + bo[None, :, None]


if __name__ == "__main__":
    # FOCUS(dim=32, heads=4, dim_head=16, local_aggr_kernel=5)
    B, C, N = 2, 32, 64
    heads, dim_head, K = 4, 16, 5
    inner = heads * dim_head

    key = jax.random.PRNGKey(0)
    kx, kg, kb, kv, kr, krb, ko, kob = jax.random.split(key, 8)

    x = jax.random.normal(kx, (B, C, N), jnp.float32)

    # deterministic synthetic parameters (shapes per the module's __init__)
    gamma = 1.0 + 0.1 * jax.random.normal(kg, (C,), jnp.float32)          # BatchNorm1d.weight
    beta = 0.05 * jax.random.normal(kb, (C,), jnp.float32)                # BatchNorm1d.bias
    wv = jax.random.normal(kv, (inner, C), jnp.float32) / np.sqrt(C)      # to_v.weight (inner,C,1)
    wr = jax.random.normal(kr, (heads, K), jnp.float32) / np.sqrt(K)      # rel_pos.weight (H,1,K)
    br = 0.05 * jax.random.normal(krb, (heads,), jnp.float32)             # rel_pos.bias (H,)
    wo = jax.random.normal(ko, (C, inner), jnp.float32) / np.sqrt(inner)  # to_out.weight (C,inner,1)
    bo = 0.05 * jax.random.normal(kob, (C,), jnp.float32)                 # to_out.bias (C,)

    # one-time fold, hoisted out of the per-call jitted path
    params, wk_stacked, masks = fold_focus_params(
        gamma, beta, wv, wr, br, wo, bo, heads=heads, batch=B, seq=N)

    run = jax.jit(focus_forward)
    y = jax.block_until_ready(run(x, params, wk_stacked, masks))

    y_ref = focus_reference(x, gamma, beta, wv, wr, br, wo, bo, heads=heads)
    np.testing.assert_allclose(np.asarray(y), np.asarray(y_ref), rtol=2e-2, atol=2e-2)

    print("KERNEL_OK")
</pallas_src>

<mosaic_0001>
module attributes {stable_mosaic.version = 11 : i64} {
  func.func @focus_kernel(%arg0: memref<2x32x64xf32, #tpu.memory_space<vmem>>, %arg1: memref<32x3xf32, #tpu.memory_space<vmem>>, %arg2: memref<32x160xbf16, #tpu.memory_space<vmem>>, %arg3: memref<5x128xf32, #tpu.memory_space<vmem>>, %arg4: memref<2x32x64xf32, #tpu.memory_space<vmem>>) attributes {dimension_semantics = [], scalar_prefetch = 0 : i64, scratch_operands = 0 : i64, tpu.core_type = #tpu.core_type<tc>} {
    %c0 = arith.constant 0 : index
    %c0_0 = arith.constant 0 : index
    %c0_1 = arith.constant 0 : index
    %0 = vector.load %arg0[%c0, %c0_0, %c0_1] : memref<2x32x64xf32, #tpu.memory_space<vmem>>, vector<1x32x64xf32>
    %1 = vector.shape_cast %0 : vector<1x32x64xf32> to vector<32x64xf32>
    %c1 = arith.constant 1 : index
    %c0_2 = arith.constant 0 : index
    %c0_3 = arith.constant 0 : index
    %2 = vector.load %arg0[%c1, %c0_2, %c0_3] : memref<2x32x64xf32, #tpu.memory_space<vmem>>, vector<1x32x64xf32>
    %3 = vector.shape_cast %2 : vector<1x32x64xf32> to vector<32x64xf32>
    %4 = tpu.concatenate %1, %3 in 1 : vector<32x64xf32>, vector<32x64xf32> -> vector<32x128xf32>
    %cst = arith.constant dense<0.000000e+00> : vector<32xf32>
    %5 = vector.multi_reduction <add>, %4, %cst [1] : vector<32x128xf32> to vector<32xf32>
    %6 = vector.shape_cast %5 : vector<32xf32> to vector<32x1xf32>
    %7 = arith.mulf %4, %4 : vector<32x128xf32>
    %cst_4 = arith.constant dense<0.000000e+00> : vector<32xf32>
    %8 = vector.multi_reduction <add>, %7, %cst_4 [1] : vector<32x128xf32> to vector<32xf32>
    %9 = vector.shape_cast %8 : vector<32xf32> to vector<32x1xf32>
    %cst_5 = arith.constant 7.812500e-03 : f32
    %10 = vector.broadcast %cst_5 : f32 to vector<32x1xf32>
    %11 = arith.mulf %6, %10 : vector<32x1xf32>
    %cst_6 = arith.constant 7.812500e-03 : f32
    %12 = vector.broadcast %cst_6 : f32 to vector<32x1xf32>
    %13 = arith.mulf %9, %12 : vector<32x1xf32>
    %14 = arith.mulf %11, %11 : vector<32x1xf32>
    %15 = arith.subf %13, %14 : vector<32x1xf32>
    %cst_7 = arith.constant 0.000000e+00 : f32
    %16 = vector.broadcast %cst_7 : f32 to vector<32x1xf32>
    %17 = arith.maximumf %15, %16 : vector<32x1xf32>
    %c0_8 = arith.constant 0 : index
    %c0_9 = arith.constant 0 : index
    %18 = vector.load %arg1[%c0_8, %c0_9] : memref<32x3xf32, #tpu.memory_space<vmem>>, vector<32x1xf32>
    %c0_10 = arith.constant 0 : index
    %c1_11 = arith.constant 1 : index
    %19 = vector.load %arg1[%c0_10, %c1_11] : memref<32x3xf32, #tpu.memory_space<vmem>>, vector<32x1xf32>
    %c0_12 = arith.constant 0 : index
    %c2 = arith.constant 2 : index
    %20 = vector.load %arg1[%c0_12, %c2] : memref<32x3xf32, #tpu.memory_space<vmem>>, vector<32x1xf32>
    %cst_13 = arith.constant 9.99999974E-6 : f32
    %21 = vector.broadcast %cst_13 : f32 to vector<32x1xf32>
    %22 = arith.addf %17, %21 : vector<32x1xf32>
    %23 = math.rsqrt %22 : vector<32x1xf32>
    %24 = arith.mulf %23, %18 : vector<32x1xf32>
    %25 = arith.mulf %11, %24 : vector<32x1xf32>
    %26 = arith.subf %19, %25 : vector<32x1xf32>
    %27 = vector.broadcast %24 : vector<32x1xf32> to vector<32x128xf32>
    %28 = arith.mulf %4, %27 : vector<32x128xf32>
    %29 = vector.broadcast %26 : vector<32x1xf32> to vector<32x128xf32>
    %30 = arith.addf %28, %29 : vector<32x128xf32>
    %c0_14 = arith.constant 0 : index
    %c0_15 = arith.constant 0 : index
    %31 = vector.load %arg3[%c0_14, %c0_15] : memref<5x128xf32, #tpu.memory_space<vmem>>, vector<5x128xf32>
    %c2_i32 = arith.constant 2 : i32
    %32 = tpu.dynamic_rotate %30 by %c2_i32 dim 1 : vector<32x128xf32>, i32 -> vector<32x128xf32>
    %33 = vector.extract_strided_slice %31 {offsets = [0, 0], sizes = [1, 128], strides = [1, 1]} : vector<5x128xf32> to vector<1x128xf32>
    %34 = vector.broadcast %33 : vector<1x128xf32> to vector<32x128xf32>
    %35 = arith.mulf %32, %34 : vector<32x128xf32>
    %c1_i32 = arith.constant 1 : i32
    %36 = tpu.dynamic_rotate %30 by %c1_i32 dim 1 : vector<32x128xf32>, i32 -> vector<32x128xf32>
    %37 = vector.extract_strided_slice %31 {offsets = [1, 0], sizes = [1, 128], strides = [1, 1]} : vector<5x128xf32> to vector<1x128xf32>
    %38 = vector.broadcast %37 : vector<1x128xf32> to vector<32x128xf32>
    %39 = arith.mulf %36, %38 : vector<32x128xf32>
    %c127_i32 = arith.constant 127 : i32
    %40 = tpu.dynamic_rotate %30 by %c127_i32 dim 1 : vector<32x128xf32>, i32 -> vector<32x128xf32>
    %41 = vector.extract_strided_slice %31 {offsets = [3, 0], sizes = [1, 128], strides = [1, 1]} : vector<5x128xf32> to vector<1x128xf32>
    %42 = vector.broadcast %41 : vector<1x128xf32> to vector<32x128xf32>
    %43 = arith.mulf %40, %42 : vector<32x128xf32>
    %c126_i32 = arith.constant 126 : i32
    %44 = tpu.dynamic_rotate %30 by %c126_i32 dim 1 : vector<32x128xf32>, i32 -> vector<32x128xf32>
    %45 = vector.extract_strided_slice %31 {offsets = [4, 0], sizes = [1, 128], strides = [1, 1]} : vector<5x128xf32> to vector<1x128xf32>
    %46 = vector.broadcast %45 : vector<1x128xf32> to vector<32x128xf32>
    %47 = arith.mulf %44, %46 : vector<32x128xf32>
    %48 = tpu.concatenate %35, %39, %30, %43, %47 in 0 : vector<32x128xf32>, vector<32x128xf32>, vector<32x128xf32>, vector<32x128xf32>, vector<32x128xf32> -> vector<160x128xf32>
    %49 = arith.truncf %48 : vector<160x128xf32> to vector<160x128xbf16>
    %c0_16 = arith.constant 0 : index
    %c0_17 = arith.constant 0 : index
    %50 = vector.load %arg2[%c0_16, %c0_17] : memref<32x160xbf16, #tpu.memory_space<vmem>>, vector<32x160xbf16>
    %cst_18 = arith.constant dense<0.000000e+00> : vector<32x128xf32>
    %51 = tpu.matmul %50, %49, %cst_18 {dimension_numbers = #tpu.dot_dimension_numbers<[1], [0], [0], [1], [0, 0, 1, 1], [], []>} : vector<32x160xbf16>, vector<160x128xbf16>, vector<32x128xf32> -> vector<32x128xf32>
    %52 = vector.broadcast %20 : vector<32x1xf32> to vector<32x128xf32>
    %53 = arith.addf %51, %52 : vector<32x128xf32>
    %54 = vector.extract_strided_slice %53 {offsets = [0, 0], sizes = [32, 64], strides = [1, 1]} : vector<32x128xf32> to vector<32x64xf32>
    %c0_19 = arith.constant 0 : index
    %c0_20 = arith.constant 0 : index
    %c0_21 = arith.constant 0 : index
    %55 = vector.load %arg4[%c0_19, %c0_20, %c0_21] : memref<2x32x64xf32, #tpu.memory_space<vmem>>, vector<1x32x64xf32>
    %56 = vector.shape_cast %55 : vector<1x32x64xf32> to vector<32x64xf32>
    %57 = vector.shape_cast %54 : vector<32x64xf32> to vector<1x32x64xf32>
    tpu.vector_store %arg4[%c0_19, %c0_20, %c0_21], %57 {strides = array<i32>} : memref<2x32x64xf32, #tpu.memory_space<vmem>>, vector<1x32x64xf32>,
    %58 = vector.extract_strided_slice %53 {offsets = [0, 64], sizes = [32, 64], strides = [1, 1]} : vector<32x128xf32> to vector<32x64xf32>
    %c1_22 = arith.constant 1 : index
    %c0_23 = arith.constant 0 : index
    %c0_24 = arith.constant 0 : index
    %59 = vector.load %arg4[%c1_22, %c0_23, %c0_24] : memref<2x32x64xf32, #tpu.memory_space<vmem>>, vector<1x32x64xf32>
    %60 = vector.shape_cast %59 : vector<1x32x64xf32> to vector<32x64xf32>
    %61 = vector.shape_cast %58 : vector<32x64xf32> to vector<1x32x64xf32>
    tpu.vector_store %arg4[%c1_22, %c0_23, %c0_24], %61 {strides = array<i32>} : memref<2x32x64xf32, #tpu.memory_space<vmem>>, vector<1x32x64xf32>,
    return
  }
}

</mosaic_0001>

<bundles_post_ra>
// kernel: focus_forward.1
= control target key start
LH: loop header
LB: loop body
LE: loop exit
PB: predicated region body
PF: predicated region fallthrough
CT: control target
= control target key end

     0   :  { %9 = vsyncpa [#allocation3], 0  ;;  %s692_s0 = inlined_call_operand.hbm [shape: f32[2,32,64], index: 0, kind: input, shape index: {}]   ;;  %s693_s1 = inlined_call_operand.vmem [shape: f32[32,3], index: 1, kind: input, shape index: {}]   ;;  %s694_s2 = inlined_call_operand.vmem [shape: bf16[32,160], index: 2, kind: input, shape index: {}]   ;;  %s695_s3 = inlined_call_operand.vmem [shape: f32[5,128], index: 3, kind: input, shape index: {}]   ;;  %s696_s4 = inlined_call_operand.hbm [shape: f32[2,32,64], index: 4, kind: output, shape index: {}]  }
   0x1   :  { %10 = vsyncpa [#allocation4], 0  ;;  %s508_s15 = smov [#allocation2]  }
   0x2   :  { %s16_s16 = sshll.u32 %s508_s15, 4  ;;  %s17_s16 = int_to_ptr.vmem [resolvable:$true] %s16_s16 }
   0x3   :  { %s472_s17 = scalar_lea.vmem %s17_s16, 1024  ;;  %p477_p1 = scmp.lt.s32.totalorder %s17_s16, %s17_s16 }
   0x4   :  { %p473_p0 = scmp.ne.s32.totalorder %s17_s16, %s472_s17  ;;  %p478_p2 = scmp.lt.s32.totalorder %s472_s17, %s472_s17 }
   0x6   :  { %p479_p3 = por %p478_p2, %p477_p1 }
   0x8   :  { %p480_p4 = pnand %p479_p3, %p473_p0 }
   0xa   :  { %483 = shalt.err (!%p480_p4)
}
   0xb   :  { %s509_s18 = smov 128   ;;  %s510_s19 = smov 8  }
   0xc   :  { %22 = dma.hbm_to_vmem [thread:$0]  %s692_s0, 1024, %s17_s16, [#allocation3], %s509_s18, %s509_s18, %s510_s19  }
   0xd   :  { %504 = dma.done.wait [#allocation3], 1024  }
   0xe   :  { %505 = vsyncadd [#allocation3], 4294966272  ;;  %v40_v0 = vld [vmem:[#allocation2 + $0x30] sm:$0xff]  ;;  %v38_v1 = vld [vmem:[#allocation2 + $0x20] sm:$0xff]  ;;  %s511_s22 = smov 64   ;;  %vm58_vm0 = vcmask 523264  }
   0xf   :  { %50 = vrot.lane.b32.xlu0 %v40_v0, %s511_s22  ;;  %46 = vrot.lane.b32.xlu1 %v38_v1, %s511_s22  ;;  %v41_v2 = vld [vmem:[#allocation2 + $0x38] sm:$0xff]  ;;  %v39_v3 = vld [vmem:[#allocation2 + $0x28] sm:$0xff]  ;;  %v35_v4 = vld [vmem:[#allocation2 + $0x10] sm:$0xff]  ;;  %v512_v20 = vmov 0   ;;  %s513_s28 = smov 1   ;;  %s516_s5 = smov 2  }
  0x10   :  { %v36_v8 = vld [vmem:[#allocation2 + $0x18] sm:$0xff]  ;;  %v34_v9 = vld [vmem:[#allocation2 + $0x8] sm:$0xff]  ;;  %v33_v14 = vld [vmem:[#allocation2] sm:$0xff]  ;;  %444 = vset.pattern.permute.xlu0 %v512_v20  ;;  %445 = vset.pattern.permute.xlu1 %v512_v20  ;;  %s517_s6 = smov 126   ;;  %vm308_vm1 = vcmask 261120  }
  0x11   :  { %315 = vmatprep.subr.bf16.mxu0 %v512_v20  ;;  %412 = vmatprep.subr.bf16.mxu1 %v512_v20  ;;  %v586_v53 = vld [vmem:[%s693_s1 + $0x10] sm:$0xff]  ;;  %v592_v56 = vld [vmem:[%s693_s1 + $0x18] sm:$0xff]  ;;  %v597_v58 = vld [vmem:[%s693_s1] sm:$0xff] }
  0x12   :  { %v605_v63 = vld [vmem:[%s693_s1 + $0x8] sm:$0xff]  ;;  %s515_s1 = smov 127  }
  0x13   :  { %52 = vrot.lane.b32.xlu0 %v41_v2, %s511_s22  ;;  %48 = vrot.lane.b32.xlu1 %v39_v3, %s511_s22 }
  0x81   :  { %v51_v5 = vpop.permute.xlu0 %50  ;;  %v47_v6 = vpop.permute.xlu1 %46 }
  0x82   :  { %v556_v7 = vsel %vm58_vm0, %v35_v4, %v51_v5  ;;  %v570_v16 = vsel %vm58_vm0, %v33_v14, %v47_v6  ;;  %v514_v5 = vmov 1  }
  0x83   :  { %67 = vadd.xlane.f32.xlu0 %v556_v7  ;;  %v73_v15 = vmul.f32 %v556_v7, %v556_v7  ;;  %v71_v18 = vmul.f32 %v570_v16, %v570_v16 }
  0x85   :  { %v53_v10 = vpop.permute.xlu0 %52  ;;  %v49_v11 = vpop.permute.xlu1 %48 }
  0x86   :  { %v560_v12 = vsel %vm58_vm0, %v36_v8, %v53_v10  ;;  %v563_v13 = vsel %vm58_vm0, %v34_v9, %v49_v11 }
  0x87   :  { %69 = vadd.xlane.f32.xlu1 %v560_v12  ;;  %65 = vadd.xlane.f32.xlu0 %v563_v13  ;;  %v74_v17 = vmul.f32 %v560_v12, %v560_v12  ;;  %v72_v19 = vmul.f32 %v563_v13, %v563_v13 }
  0x8b   :  { %79 = vadd.xlane.f32.xlu0 %v73_v15  ;;  %63 = vadd.xlane.f32.xlu1 %v570_v16 }
  0x8f   :  { %81 = vadd.xlane.f32.xlu0 %v74_v17  ;;  %75 = vadd.xlane.f32.xlu1 %v71_v18 }
  0x93   :  { %77 = vadd.xlane.f32.xlu0 %v72_v19 }
 0x10c   :  { %v68_v21 = vpop.xlane.xlu0 %67 }
 0x10d   :  { %v85_v24 = vmul.f32 0.0078125, %v68_v21 }
 0x10f   :  { %v93_v28 = vmul.f32 %v85_v24, %v85_v24 }
 0x110   :  { %v70_v22 = vpop.xlane.xlu1 %69  ;;  %v66_v23 = vpop.xlane.xlu0 %65 }
 0x111   :  { %v86_v25 = vmul.f32 0.0078125, %v70_v22  ;;  %v84_v33 = vmul.f32 0.0078125, %v66_v23 }
 0x113   :  { %v94_v32 = vmul.f32 %v86_v25, %v86_v25  ;;  %v92_v43 = vmul.f32 %v84_v33, %v84_v33 }
 0x114   :  { %v80_v26 = vpop.xlane.xlu0 %79  ;;  %v64_v27 = vpop.xlane.xlu1 %63 }
 0x115   :  { %v89_v29 = vmul.f32 0.0078125, %v80_v26  ;;  %v83_v30 = vmul.f32 0.0078125, %v64_v27 }
 0x117   :  { %v97_v31 = vsub.f32 %v89_v29, %v93_v28  ;;  %v91_v37 = vmul.f32 %v83_v30, %v83_v30 }
 0x118   :  { %v82_v34 = vpop.xlane.xlu0 %81  ;;  %v76_v35 = vpop.xlane.xlu1 %75 }
 0x119   :  { %v101_v36 = vmax.f32 %v97_v31, 0.0  ;;  %v90_v38 = vmul.f32 0.0078125, %v82_v34  ;;  %v87_v39 = vmul.f32 0.0078125, %v76_v35 }
 0x11b   :  { %v109_v40 = vadd.f32 1e-05, %v101_v36  ;;  %v98_v41 = vsub.f32 %v90_v38, %v94_v32  ;;  %v95_v42 = vsub.f32 %v87_v39, %v91_v37  ;;  %v200_v36 = vlaneseq  ;;  %v191_v39 = vld [vmem:[%s695_s3] sm:$0x1f] }
 0x11c   :  { %v78_v44 = vpop.xlane.xlu0 %77 }
 0x11d   :  { %456 = vrsqrt.f32 %v109_v40  ;;  %v102_v45 = vmax.f32 %v98_v41, 0.0  ;;  %v99_v46 = vmax.f32 %v95_v42, 0.0  ;;  %v88_v47 = vmul.f32 0.0078125, %v78_v44 }
 0x11e   :  { %v637_v37 = vshrl.u32 %v200_v36, 7 }
 0x11f   :  { %v110_v48 = vadd.f32 1e-05, %v102_v45  ;;  %v107_v49 = vadd.f32 1e-05, %v99_v46  ;;  %v96_v50 = vsub.f32 %v88_v47, %v92_v43 }
 0x120   :  { %v234_v38 = vsub.s32 3, %v637_v37 }
 0x121   :  { %458 = vrsqrt.f32 %v110_v48  ;;  %v100_v51 = vmax.f32 %v96_v50, 0.0 }
 0x122   :  { %460 = vrsqrt.f32 %v107_v49  ;;  %v235_v40 = vrot.slane %v191_v39, %v234_v38 }
 0x123   :  { %v108_v52 = vadd.f32 1e-05, %v100_v51  ;;  %v218_v51 = vsub.s32 1, %v637_v37 }
 0x125   :  { %462 = vrsqrt.f32 %v108_v52 }
 0x12a   :  { %v457_v54 = vpop.eup %456 }
 0x12b   :  { %v117_v55 = vmul.f32 %v457_v54, %v586_v53  ;;  %v219_v54 = vrot.slane %v191_v39, %v218_v51 }
 0x12d   :  { %v121_v57 = vmul.f32 %v117_v55, %v85_v24 }
 0x12e   :  { %v459_v59 = vpop.eup %458 }
 0x12f   :  { %v461_v60 = vpop.eup %460  ;;  %131 = vrot.lane.b32.xlu1 %v121_v57, %s513_s28  ;;  %v118_v61 = vmul.f32 %v459_v59, %v592_v56  ;;  %v202_v59 = vsub.s32 0, %v637_v37 }
 0x130   :  { %v115_v62 = vmul.f32 %v461_v60, %v597_v58 }
 0x131   :  { %v122_v0 = vmul.f32 %v118_v61, %v86_v25 }
 0x132   :  { %v463_v1 = vpop.eup %462  ;;  %v119_v2 = vmul.f32 %v115_v62, %v83_v30 }
 0x133   :  { %133 = vrot.lane.b32.xlu0 %v122_v0, %s513_s28  ;;  %v116_v3 = vmul.f32 %v463_v1, %v605_v63  ;;  %v203_v1 = vrot.slane %v191_v39, %v202_v59 }
 0x134   :  { %127 = vrot.lane.b32.xlu1 %v119_v2, %s513_s28 }
 0x135   :  { %v120_v4 = vmul.f32 %v116_v3, %v84_v33 }
 0x137   :  { %155 = vperm.xlu0 %444, %v117_v55  }
 0x138   :  { %129 = vrot.lane.b32.xlu1 %v120_v4, %s513_s28 }
 0x13b   :  { %447 = vset.pattern.permute.xlu0 %v514_v5 }
 0x13c   :  { %160 = vperm.xlu1 %445, %v118_v61  }
 0x140   :  { %145 = vperm.xlu1 %445, %v115_v62  }
 0x144   :  { %150 = vperm.xlu1 %445, %v116_v3  }
 0x148   :  { %446 = vset.pattern.permute.xlu1 %v514_v5 }
 0x1a1   :  { %v132_v6 = vpop.permute.xlu1 %131 }
 0x1a2   :  { %v141_v8 = vsub.f32 %v586_v53, %v132_v6 }
 0x1a4   :  { %179 = vperm.xlu1 %446, %v141_v8   ;;  %v250_v8 = vsub.s32 4, %v637_v37 }
 0x1a5   :  { %v134_v9 = vpop.permute.xlu0 %133 }
 0x1a6   :  { %v142_v10 = vsub.f32 %v592_v56, %v134_v9  ;;  %v128_v11 = vpop.permute.xlu1 %127 }
 0x1a7   :  { %v139_v14 = vsub.f32 %v597_v58, %v128_v11 }
 0x1a8   :  { %184 = vperm.xlu0 %447, %v142_v10  }
 0x1aa   :  { %v130_v15 = vpop.permute.xlu1 %129 }
 0x1ab   :  { %v140_v17 = vsub.f32 %v605_v63, %v130_v15 }
 0x1ac   :  { %169 = vperm.xlu0 %447, %v139_v14  }
 0x1ad   :  { %174 = vperm.xlu1 %446, %v140_v17   ;;  %v251_v17 = vrot.slane %v191_v39, %v250_v8 }
 0x1b2   :  { %v156_v21 = vpop.permute.xlu0 %155 }
 0x1b3   :  { %v165_v23 = vmul.f32 %v156_v21, %v556_v7 }
 0x1b7   :  { %v161_v18 = vpop.permute.xlu1 %160 }
 0x1b8   :  { %v166_v26 = vmul.f32 %v161_v18, %v560_v12  ;;  %v452_v12 = vld [vmem:[%s694_s2 + $0x4] ss:$8 sps:$4 sm:$0xff]  }
 0x1b9   :  { %410 = vmatprep.mubr.msk.bf16.mxu0 %vm308_vm1, %v452_v12 }
 0x1bb   :  { %v146_v19 = vpop.permute.xlu1 %145 }
 0x1bc   :  { %v163_v29 = vmul.f32 %v146_v19, %v570_v16  ;;  %v518_v16 = vmov 2  }
 0x1bd   :  { %448 = vset.pattern.permute.xlu0 %v518_v16  ;;  %449 = vset.pattern.permute.xlu1 %v518_v16 }
 0x1bf   :  { %v151_v22 = vpop.permute.xlu1 %150 }
 0x1c0   :  { %v164_v31 = vmul.f32 %v151_v22, %v563_v13  ;;  %v455_v13 = vld [vmem:[%s694_s2 + $0x14] ss:$8 sps:$4 sm:$0xff]  }
 0x1c1   :  { %411 = vmatprep.mubr.msk.bf16.mxu1 %vm308_vm1, %v455_v13 }
 0x21f   :  { %v180_v24 = vpop.permute.xlu1 %179 }
 0x220   :  { %v189_v25 = vadd.f32 %v180_v24, %v165_v23 }
 0x222   :  { %228 = vrot.lane.b32.xlu0 %v189_v25, %s515_s1 }
 0x223   :  { %v185_v27 = vpop.permute.xlu0 %184 }
 0x224   :  { %v190_v28 = vadd.f32 %v185_v27, %v166_v26 }
 0x226   :  { %230 = vrot.lane.b32.xlu1 %v190_v28, %s515_s1  ;;  %v618_v30 = vpack.c.bf16 %v190_v28, %v189_v25 }
 0x227   :  { %v170_v32 = vpop.permute.xlu0 %169 }
 0x228   :  { %v187_v33 = vadd.f32 %v170_v32, %v163_v29  ;;  %v175_v34 = vpop.permute.xlu1 %174  ;;  %v453_v29 = vld [vmem:[%s694_s2 + $0x10] ss:$8 sps:$4 sm:$0xff]  }
 0x229   :  { %v188_v35 = vadd.f32 %v175_v34, %v164_v31 }
 0x22a   :  { %224 = vrot.lane.b32.xlu0 %v187_v33, %s515_s1 }
 0x22b   :  { %226 = vrot.lane.b32.xlu1 %v188_v35, %s515_s1  ;;  %v621_v7 = vpack.c.bf16 %v188_v35, %v187_v33 }
 0x22e   :  { %212 = vrot.lane.b32.xlu0 %v189_v25, %s513_s28 }
 0x22f   :  { %214 = vrot.lane.b32.xlu1 %v190_v28, %s513_s28 }
 0x232   :  { %208 = vrot.lane.b32.xlu0 %v187_v33, %s513_s28 }
 0x233   :  { %210 = vrot.lane.b32.xlu1 %v188_v35, %s513_s28 }
 0x236   :  { %196 = vrot.lane.b32.xlu0 %v189_v25, %s516_s5 }
 0x237   :  { %198 = vrot.lane.b32.xlu1 %v190_v28, %s516_s5 }
 0x23a   :  { %192 = vrot.lane.b32.xlu0 %v187_v33, %s516_s5 }
 0x23b   :  { %194 = vrot.lane.b32.xlu1 %v188_v35, %s516_s5 }
 0x23e   :  { %244 = vrot.lane.b32.xlu0 %v189_v25, %s517_s6 }
 0x23f   :  { %246 = vrot.lane.b32.xlu1 %v190_v28, %s517_s6  ;;  %v450_v28 = vld [vmem:[%s694_s2] ss:$8 sps:$4 sm:$0xff]   ;;  %s519_s2 = smov [#allocation5]  }
 0x240   :  { %s394_s16 = sshll.u32 %s519_s2, 4  ;;  %s395_s16 = int_to_ptr.vmem [resolvable:$true] %s394_s16 }
 0x241   :  { %s484_s17 = scalar_lea.vmem %s395_s16, 1024  ;;  %p489_p6 = scmp.lt.s32.totalorder %s395_s16, %s395_s16 }
 0x242   :  { %240 = vrot.lane.b32.xlu0 %v187_v33, %s517_s6  ;;  %p485_p5 = scmp.ne.s32.totalorder %s395_s16, %s484_s17  ;;  %p490_p7 = scmp.lt.s32.totalorder %s484_s17, %s484_s17 }
 0x243   :  { %242 = vrot.lane.b32.xlu1 %v188_v35, %s517_s6 }
 0x244   :  { %p491_p8 = por %p490_p7, %p489_p6 }
 0x246   :  { %272 = vperm.xlu0 %448, %v597_v58   ;;  %p492_p9 = pnand %p491_p8, %p485_p5 }
 0x247   :  { %277 = vperm.xlu1 %449, %v605_v63  }
 0x24a   :  { %287 = vperm.xlu0 %448, %v592_v56  }
 0x24b   :  { %282 = vperm.xlu1 %449, %v586_v53  }
 0x294   :  { %v229_v41 = vpop.permute.xlu0 %228 }
 0x295   :  { %v238_v43 = vmul.f32 %v235_v40, %v229_v41 }
 0x298   :  { %v231_v42 = vpop.permute.xlu1 %230 }
 0x299   :  { %v239_v44 = vmul.f32 %v235_v40, %v231_v42 }
 0x29b   :  { %v263_v45 = vpack.c.bf16 %v239_v44, %v238_v43 }
 0x29c   :  { %v225_v46 = vpop.permute.xlu0 %224 }
 0x29d   :  { %v236_v47 = vmul.f32 %v235_v40, %v225_v46  ;;  %v227_v48 = vpop.permute.xlu1 %226  ;;  %316 = vmatpush1.bf16.msra.mxu0 %v263_v45  ;;  %422 = vmatpush1.bf16.msra.mxu1 %v263_v45 }
 0x29e   :  { %v237_v49 = vmul.f32 %v235_v40, %v227_v48  ;;  %317 = vmatprep.subr.bf16.mxu0 %v512_v20  ;;  %413 = vmatprep.subr.bf16.mxu1 %v512_v20 }
 0x2a0   :  { %v262_v50 = vpack.c.bf16 %v237_v49, %v236_v47  ;;  %v213_v52 = vpop.permute.xlu0 %212 }
 0x2a1   :  { %v215_v53 = vpop.permute.xlu1 %214  ;;  %v222_v57 = vmul.f32 %v219_v54, %v213_v52 }
 0x2a2   :  { %318 = vmatpush1.bf16.msra.mxu0 %v262_v50  ;;  %423 = vmatpush1.bf16.msra.mxu1 %v262_v50  ;;  %v223_v58 = vmul.f32 %v219_v54, %v215_v53 }
 0x2a3   :  { %319 = vmatprep.subr.bf16.mxu0 %v512_v20  ;;  %414 = vmatprep.subr.bf16.mxu1 %v512_v20 }
 0x2a4   :  { %v209_v55 = vpop.permute.xlu0 %208  ;;  %v259_v62 = vpack.c.bf16 %v223_v58, %v222_v57 }
 0x2a5   :  { %v211_v56 = vpop.permute.xlu1 %210  ;;  %v220_v63 = vmul.f32 %v219_v54, %v209_v55 }
 0x2a6   :  { %320 = vmatpush1.bf16.msra.mxu0 %v618_v30  ;;  %424 = vmatpush1.bf16.msra.mxu1 %v618_v30  ;;  %v221_v0 = vmul.f32 %v219_v54, %v211_v56 }
 0x2a7   :  { %321 = vmatprep.subr.bf16.mxu0 %v512_v20  ;;  %415 = vmatprep.subr.bf16.mxu1 %v512_v20 }
 0x2a8   :  { %v197_v60 = vpop.permute.xlu0 %196  ;;  %v258_v4 = vpack.c.bf16 %v221_v0, %v220_v63 }
 0x2a9   :  { %v199_v61 = vpop.permute.xlu1 %198  ;;  %v206_v5 = vmul.f32 %v203_v1, %v197_v60 }
 0x2aa   :  { %322 = vmatpush1.bf16.msra.mxu0 %v621_v7  ;;  %425 = vmatpush1.bf16.msra.mxu1 %v621_v7  ;;  %v207_v6 = vmul.f32 %v203_v1, %v199_v61 }
 0x2ab   :  { %323 = vmatprep.subr.bf16.mxu0 %v512_v20  ;;  %416 = vmatprep.subr.bf16.mxu1 %v512_v20 }
 0x2ac   :  { %v193_v2 = vpop.permute.xlu0 %192  ;;  %v257_v11 = vpack.c.bf16 %v207_v6, %v206_v5 }
 0x2ad   :  { %v195_v3 = vpop.permute.xlu1 %194  ;;  %v204_v14 = vmul.f32 %v203_v1, %v193_v2 }
 0x2ae   :  { %324 = vmatpush1.bf16.msra.mxu0 %v259_v62  ;;  %426 = vmatpush1.bf16.msra.mxu1 %v259_v62  ;;  %v205_v15 = vmul.f32 %v203_v1, %v195_v3 }
 0x2af   :  { %325 = vmatprep.subr.bf16.mxu0 %v512_v20  ;;  %417 = vmatprep.subr.bf16.mxu1 %v512_v20 }
 0x2b0   :  { %v245_v9 = vpop.permute.xlu0 %244  ;;  %v256_v18 = vpack.c.bf16 %v205_v15, %v204_v14 }
 0x2b1   :  { %v247_v10 = vpop.permute.xlu1 %246  ;;  %v254_v19 = vmul.f32 %v251_v17, %v245_v9 }
 0x2b2   :  { %326 = vmatpush1.bf16.msra.mxu0 %v258_v4  ;;  %427 = vmatpush1.bf16.msra.mxu1 %v258_v4  ;;  %v255_v21 = vmul.f32 %v251_v17, %v247_v10 }
 0x2b3   :  { %327 = vmatprep.subr.bf16.mxu0 %v512_v20  ;;  %418 = vmatprep.subr.bf16.mxu1 %v512_v20 }
 0x2b4   :  { %v241_v22 = vpop.permute.xlu0 %240  ;;  %v265_v24 = vpack.c.bf16 %v255_v21, %v254_v19 }
 0x2b5   :  { %v243_v23 = vpop.permute.xlu1 %242  ;;  %v252_v25 = vmul.f32 %v251_v17, %v241_v22 }
 0x2b6   :  { %328 = vmatpush1.bf16.msra.mxu0 %v257_v11  ;;  %428 = vmatpush1.bf16.msra.mxu1 %v257_v11  ;;  %v253_v26 = vmul.f32 %v251_v17, %v243_v23 }
 0x2b7   :  { %329 = vmatprep.subr.bf16.mxu0 %v512_v20  ;;  %419 = vmatprep.subr.bf16.mxu1 %v512_v20 }
 0x2b8   :  { %v264_v27 = vpack.c.bf16 %v253_v26, %v252_v25 }
 0x2ba   :  { %330 = vmatpush1.bf16.msra.mxu0 %v256_v18  ;;  %429 = vmatpush1.bf16.msra.mxu1 %v256_v18 }
 0x2bb   :  { %343 = vmatprep.subr.bf16.mxu0 %v512_v20  ;;  %420 = vmatprep.subr.bf16.mxu1 %v512_v20 }
 0x2be   :  { %344 = vmatpush2.bf16.msra.mxu0 %v265_v24  ;;  %430 = vmatpush2.bf16.msra.mxu1 %v265_v24 }
 0x2bf   :  { %345 = vmatprep.subr.bf16.mxu0 %v512_v20  ;;  %421 = vmatprep.subr.bf16.mxu1 %v512_v20 }
 0x2c1   :  { %v273_v31 = vpop.permute.xlu0 %272 }
 0x2c2   :  { %346 = vmatpush2.bf16.msra.mxu0 %v264_v27  ;;  %431 = vmatpush2.bf16.msra.mxu1 %v264_v27  ;;  %v278_v30 = vpop.permute.xlu1 %277 }
 0x2c5   :  { %348 = vmatmul.mubr.bf16.vlgmr.msra.gmra.mxu0 %v450_v28  ;;  %356 = vmatmul.mubr.bf16.vlgmr.msra.gmra.mxu1 %v453_v29  ;;  %v288_v20 = vpop.permute.xlu0 %287 }
 0x2c6   :  { %v283_v32 = vpop.permute.xlu1 %282 }
 0x385   :  { %v349_v33 = vpop.f32.mrf.mxu0  ;;  %v357_v34 = vpop.f32.mrf.mxu1 }
 0x386   :  { %v350_v35 = vadd.f32 %v349_v33, %v273_v31  ;;  %v358_v7 = vadd.f32 %v357_v34, %v283_v32 }
 0x387   :  { %v351_v12 = vpop.f32.mrf.mxu0  ;;  %v359_v13 = vpop.f32.mrf.mxu1 }
 0x388   :  { %364 = vst.msk [vmem:[#allocation5] sm:$0xff] %vm58_vm0, %v350_v35  ;;  %372 = vrot.lane.b32.xlu1 %v350_v35, %s511_s22  ;;  %366 = vst.msk [vmem:[#allocation5 + $0x10] sm:$0xff] %vm58_vm0, %v358_v7 }
 0x389   :  { %v352_v16 = vpop.f32.mrf.mxu0  ;;  %v360_v36 = vpop.f32.mrf.mxu1 }
 0x38a   :  { %v353_v37 = vadd.f32 %v352_v16, %v278_v30  ;;  %v361_v38 = vadd.f32 %v360_v36, %v288_v20 }
 0x38b   :  { %v354_v39 = vpop.f32.mrf.mxu0  ;;  %v362_v40 = vpop.f32.mrf.mxu1 }
 0x38c   :  { %365 = vst.msk [vmem:[#allocation5 + $0x8] sm:$0xff] %vm58_vm0, %v353_v37  ;;  %367 = vst.msk [vmem:[#allocation5 + $0x18] sm:$0xff] %vm58_vm0, %v361_v38  ;;  %374 = vrot.lane.b32.xlu0 %v353_v37, %s511_s22  ;;  %376 = vrot.lane.b32.xlu1 %v358_v7, %s511_s22 }
 0x390   :  { %378 = vrot.lane.b32.xlu0 %v361_v38, %s511_s22 }
 0x3fa   :  { %v373_v41 = vpop.permute.xlu1 %372 }
 0x3fb   :  { %385 = vst.msk [vmem:[#allocation5 + $0x20] sm:$0xff] %vm58_vm0, %v373_v41 }
 0x3fe   :  { %v375_v42 = vpop.permute.xlu0 %374  ;;  %v377_v43 = vpop.permute.xlu1 %376 }
 0x3ff   :  { %386 = vst.msk [vmem:[#allocation5 + $0x28] sm:$0xff] %vm58_vm0, %v375_v42  ;;  %387 = vst.msk [vmem:[#allocation5 + $0x30] sm:$0xff] %vm58_vm0, %v377_v43 }
 0x402   :  { %v379_v44 = vpop.permute.xlu0 %378 }
 0x403   :  { %388 = vst.msk [vmem:[#allocation5 + $0x38] sm:$0xff] %vm58_vm0, %v379_v44 }
 0x404   :  { %495 = shalt.err (!%p492_p9)
}
 0x405   :  { %400 = dma.vmem_to_hbm [thread:$0]  %s395_s16, 1024, %s696_s4, [#allocation4], %s509_s18, %s509_s18, %s510_s19  }
 0x406   :  { %506 = dma.done.wait [#allocation4], 1024  }
 0x407   :  { %507 = vsyncadd [#allocation4], 4294966272 }
 0x408   :  { %404 = vsyncpa [#allocation3], 1 }
 0x409   :  { %405 = vsyncpa [#allocation4], 1 }

</bundles_post_ra>
